<compile_context>
chip_gen: v7x
topology: tpu7x:2x2x1
jax: 0.10.0
libtpu: 0.0.40
codegen_flags: <defaults>
</compile_context>

<pallas_src>
import jax
import jax.numpy as jnp
from jax import lax
from jax.experimental import pallas as pl
from jax.experimental.pallas import tpu as pltpu

EPS = 1e-5


def _round_up(n, m):
    return ((n + m - 1) // m) * m


# ----------------------------------------------------------------------------
# Kernel
# ----------------------------------------------------------------------------
def fc_bn_kernel(x_ref, w_ref, gb_ref, o_ref):
    # x_ref: (B, C_in) f32   w_ref: (C_in, tile_n)   gb_ref: (2, tile_n) f32
    x = x_ref[...]
    w = w_ref[...]

    # Linear (bias intentionally omitted -- it cancels in z - mean(z)).
    # Plain MK x KN matmul: MXU-native, f32 accumulation.
    z = jnp.dot(x.astype(w.dtype), w, preferred_element_type=jnp.float32)

    # BatchNorm1d training-mode forward folded into a single scale/shift.
    mean = jnp.mean(z, axis=0, keepdims=True)            # (1, tile_n)
    zc = z - mean                                        # centered once
    var = jnp.mean(zc * zc, axis=0, keepdims=True)       # biased (1/N) variance

    gb = gb_ref[...]
    gamma = gb[0:1, :]
    beta = gb[1:2, :]
    scale = gamma * lax.rsqrt(var + EPS)                 # rsqrt -> EUP slot

    # Affine + ReLU in one pass.
    o_ref[...] = jnp.maximum(zc * scale + beta, 0.0).astype(o_ref.dtype)


# ----------------------------------------------------------------------------
# One-time parameter preparation (init time, NOT per forward call)
# ----------------------------------------------------------------------------
def prepare_params(weight, bias, gamma, beta, matmul_dtype=jnp.float32):
    """weight: (C_out, C_in) from nn.Linear.  Returns:
       w_t: (C_in, C_out_p)   pre-transposed, feature axis padded to x128
       gb : (2,   C_out_p)    row 0 = gamma (padded with 1), row 1 = beta (0)
    The linear bias is dropped: under training-mode BN it cancels exactly.
    Set matmul_dtype=jnp.bfloat16 to halve weight bytes / unlock full MXU rate
    when the accuracy budget allows."""
    del bias  # cancels in z - mean(z)
    C_out, _ = weight.shape
    C_out_p = _round_up(C_out, 128)
    pad = C_out_p - C_out
    w_t = jnp.asarray(jnp.pad(weight, ((0, pad), (0, 0))).T, matmul_dtype)
    gb = jnp.stack(
        [jnp.pad(gamma, (0, pad), constant_values=1.0),
         jnp.pad(beta, (0, pad))], axis=0).astype(jnp.float32)
    return w_t, gb


# ----------------------------------------------------------------------------
# Tile selection (generation aware)
# ----------------------------------------------------------------------------
def _num_tensorcores():
    try:
        kind = getattr(jax.devices()[0], "device_kind", "").lower()
        if "v7" in kind or "7x" in kind:
            return 2
    except Exception:
        pass
    return 1


def _pick_tile_n(B, C_out_p, num_cores):
    n_groups = C_out_p // 128                       # 128-lane groups available
    # Vreg-pressure cap: keep live f32 z tile (B, tile_n) under ~128 KB.
    max_groups_vreg = max(1, (128 * 1024) // (4 * max(B, 8) * 128))
    # Single-TC parts want the biggest tile (fewest ~0.35us grid steps).
    max_groups = min(n_groups, max_groups_vreg, 2048 // 128)
    # Multi-TC parts need >= 2 grid steps so both cores get feature tiles.
    min_steps = 2 if (num_cores >= 2 and n_groups >= 2) else 1
    best = 1
    for g in range(1, n_groups + 1):
        if n_groups % g == 0 and g <= max_groups and n_groups // g >= min_steps:
            best = g
    return best * 128


# ----------------------------------------------------------------------------
# Wrapper
# ----------------------------------------------------------------------------
def fc_bn(x, w_t, gb, c_out):
    """x: (B, C_in) f32; w_t: (C_in, C_out_p); gb: (2, C_out_p).
    Returns (B, c_out) f32 = relu(batchnorm_train(x @ W^T + b))."""
    B, C_in = x.shape
    C_in_w, C_out_p = w_t.shape
    assert C_in_w == C_in

    tile_n = _pick_tile_n(B, C_out_p, _num_tensorcores())
    grid = (C_out_p // tile_n,)

    # VMEM audit (double-buffered inputs + output tile); only set the limit
    # explicitly when we actually need more than the small default budgets.
    est_vmem = 2 * (B * C_in * x.dtype.itemsize
                    + C_in * tile_n * w_t.dtype.itemsize
                    + 2 * tile_n * 4
                    + B * tile_n * 4)
    vmem_limit = None
    if est_vmem > 12 * 1024 * 1024:
        vmem_limit = min(int(est_vmem * 2), 64 * 1024 * 1024)

    cost = pl.CostEstimate(
        flops=2 * B * C_in * C_out_p,
        transcendentals=0,
        bytes_accessed=(x.size * x.dtype.itemsize
                        + w_t.size * w_t.dtype.itemsize
                        + gb.size * gb.dtype.itemsize
                        + B * C_out_p * 4),
    )

    # TODO(synk): for large C_in add a second ("arbitrary") grid axis over C_in
    # with a VMEM f32 accumulator; not needed at these sizes.
    out = pl.pallas_call(
        fc_bn_kernel,
        out_shape=jax.ShapeDtypeStruct((B, C_out_p), jnp.float32),
        grid=grid,
        in_specs=[
            pl.BlockSpec((B, C_in), lambda j: (0, 0)),        # full batch / tile
            pl.BlockSpec((C_in, tile_n), lambda j: (0, j)),   # weight tile (KN)
            pl.BlockSpec((2, tile_n), lambda j: (0, j)),      # packed gamma/beta
        ],
        out_specs=pl.BlockSpec((B, tile_n), lambda j: (0, j)),
        compiler_params=pltpu.CompilerParams(
            dimension_semantics=("parallel",),
            vmem_limit_bytes=vmem_limit),
        cost_estimate=cost,
    )(x, w_t, gb)

    if c_out == C_out_p:
        return out                         # no padding -> skip the HBM copy
    return out[:, :c_out]


if __name__ == "__main__":
    # Small shapes consistent with FC_BN: batch=8, input_size=32, output_size=64
    B, C_in, C_out = 8, 32, 64

    key = jax.random.PRNGKey(0)
    kx, kw, kb, kg, kbe = jax.random.split(key, 5)

    x = jax.random.normal(kx, (B, C_in), dtype=jnp.float32)

    # Deterministic parameter init (mimics nn.Linear uniform init scale).
    bound = 1.0 / (C_in ** 0.5)
    weight = jax.random.uniform(kw, (C_out, C_in), jnp.float32, -bound, bound)
    bias = jax.random.uniform(kb, (C_out,), jnp.float32, -bound, bound)
    # BatchNorm affine params (nontrivial deterministic values).
    gamma = 1.0 + 0.1 * jax.random.normal(kg, (C_out,), dtype=jnp.float32)
    beta = 0.1 * jax.random.normal(kbe, (C_out,), dtype=jnp.float32)

    # One-time parameter preparation (transpose + lane-dense padding + packing).
    w_t, gb = prepare_params(weight, bias, gamma, beta)

    out = fc_bn(x, w_t, gb, C_out)
    out = jax.block_until_ready(out)

    # Pure-JAX reference (training-mode BN, biased variance, bias included --
    # the kernel drops it because it cancels in z - mean(z)).
    z = x @ weight.T + bias
    mean = z.mean(axis=0, keepdims=True)
    var = ((z - mean) ** 2).mean(axis=0, keepdims=True)
    ref = jnp.maximum((z - mean) / jnp.sqrt(var + EPS) * gamma + beta, 0.0)
    assert out.shape == (B, C_out), f"bad shape {out.shape}"
    assert jnp.allclose(out, ref, atol=1e-4, rtol=1e-4), "mismatch vs reference"

    print("KERNEL_OK")
</pallas_src>

<mosaic_0001>
module attributes {stable_mosaic.version = 11 : i64} {
  func.func @fc_bn_kernel(%arg0: i32, %arg1: memref<8x32xf32, #tpu.memory_space<vmem>>, %arg2: memref<32x128xf32, #tpu.memory_space<vmem>>, %arg3: memref<2x128xf32, #tpu.memory_space<vmem>>, %arg4: memref<8x128xf32, #tpu.memory_space<vmem>>) attributes {dimension_semantics = [#tpu.dimension_semantics<parallel>], iteration_bounds = array<i64: 1>, scalar_prefetch = 0 : i64, scratch_operands = 0 : i64, tpu.core_type = #tpu.core_type<tc>, window_params = [{pipeline_mode = #tpu.pipeline_mode<synchronous>, transform_indices = @transform_0, window_bounds = array<i64: 8, 32>}, {transform_indices = @transform_1, window_bounds = array<i64: 32, 128>}, {transform_indices = @transform_2, window_bounds = array<i64: 2, 128>}, {transform_indices = @transform_3, window_bounds = array<i64: 8, 128>}]} {
    %c0 = arith.constant 0 : index
    %c0_0 = arith.constant 0 : index
    %0 = vector.load %arg1[%c0, %c0_0] : memref<8x32xf32, #tpu.memory_space<vmem>>, vector<8x32xf32>
    %c0_1 = arith.constant 0 : index
    %c0_2 = arith.constant 0 : index
    %1 = vector.load %arg2[%c0_1, %c0_2] : memref<32x128xf32, #tpu.memory_space<vmem>>, vector<32x128xf32>
    %cst = arith.constant dense<0.000000e+00> : vector<8x128xf32>
    %2 = tpu.matmul %0, %1, %cst {dimension_numbers = #tpu.dot_dimension_numbers<[1], [0], [0], [1], [0, 0, 1, 1], [], []>} : vector<8x32xf32>, vector<32x128xf32>, vector<8x128xf32> -> vector<8x128xf32>
    %cst_3 = arith.constant dense<0.000000e+00> : vector<128xf32>
    %3 = vector.multi_reduction <add>, %2, %cst_3 [0] : vector<8x128xf32> to vector<128xf32>
    %4 = vector.shape_cast %3 : vector<128xf32> to vector<1x128xf32>
    %cst_4 = arith.constant 8.000000e+00 : f32
    %5 = vector.broadcast %cst_4 : f32 to vector<1x128xf32>
    %6 = arith.divf %4, %5 : vector<1x128xf32>
    %7 = vector.broadcast %6 : vector<1x128xf32> to vector<8x128xf32>
    %8 = arith.subf %2, %7 : vector<8x128xf32>
    %9 = arith.mulf %8, %8 : vector<8x128xf32>
    %cst_5 = arith.constant dense<0.000000e+00> : vector<128xf32>
    %10 = vector.multi_reduction <add>, %9, %cst_5 [0] : vector<8x128xf32> to vector<128xf32>
    %11 = vector.shape_cast %10 : vector<128xf32> to vector<1x128xf32>
    %cst_6 = arith.constant 8.000000e+00 : f32
    %12 = vector.broadcast %cst_6 : f32 to vector<1x128xf32>
    %13 = arith.divf %11, %12 : vector<1x128xf32>
    %c0_7 = arith.constant 0 : index
    %c0_8 = arith.constant 0 : index
    %14 = vector.load %arg3[%c0_7, %c0_8] : memref<2x128xf32, #tpu.memory_space<vmem>>, vector<2x128xf32>
    %15 = vector.extract_strided_slice %14 {offsets = [0, 0], sizes = [1, 128], strides = [1, 1]} : vector<2x128xf32> to vector<1x128xf32>
    %16 = vector.extract_strided_slice %14 {offsets = [1, 0], sizes = [1, 128], strides = [1, 1]} : vector<2x128xf32> to vector<1x128xf32>
    %cst_9 = arith.constant 9.99999974E-6 : f32
    %17 = vector.broadcast %cst_9 : f32 to vector<1x128xf32>
    %18 = arith.addf %13, %17 : vector<1x128xf32>
    %19 = math.rsqrt %18 : vector<1x128xf32>
    %20 = arith.mulf %15, %19 : vector<1x128xf32>
    %21 = vector.broadcast %20 : vector<1x128xf32> to vector<8x128xf32>
    %22 = arith.mulf %8, %21 : vector<8x128xf32>
    %23 = vector.broadcast %16 : vector<1x128xf32> to vector<8x128xf32>
    %24 = arith.addf %22, %23 : vector<8x128xf32>
    %cst_10 = arith.constant 0.000000e+00 : f32
    %25 = vector.broadcast %cst_10 : f32 to vector<8x128xf32>
    %26 = arith.maximumf %24, %25 : vector<8x128xf32>
    %c0_11 = arith.constant 0 : index
    %c0_12 = arith.constant 0 : index
    %27 = vector.load %arg4[%c0_11, %c0_12] : memref<8x128xf32, #tpu.memory_space<vmem>>, vector<8x128xf32>
    tpu.vector_store %arg4[%c0_11, %c0_12], %26 {strides = array<i32>} : memref<8x128xf32, #tpu.memory_space<vmem>>, vector<8x128xf32>,
    return
  }
  func.func @transform_0(%arg0: i32) -> (i32, i32) {
    %c0_i32 = arith.constant 0 : i32
    %c0_i32_0 = arith.constant 0 : i32
    %c0_i32_1 = arith.constant 0 : i32
    return %c0_i32, %c0_i32_0 : i32, i32
  }
  func.func @transform_1(%arg0: i32) -> (i32, i32) {
    %c0_i32 = arith.constant 0 : i32
    %c0_i32_0 = arith.constant 0 : i32
    return %c0_i32, %arg0 : i32, i32
  }
  func.func @transform_2(%arg0: i32) -> (i32, i32) {
    %c0_i32 = arith.constant 0 : i32
    %c0_i32_0 = arith.constant 0 : i32
    return %c0_i32, %arg0 : i32, i32
  }
  func.func @transform_3(%arg0: i32) -> (i32, i32) {
    %c0_i32 = arith.constant 0 : i32
    %c0_i32_0 = arith.constant 0 : i32
    return %c0_i32, %arg0 : i32, i32
  }
}

</mosaic_0001>

<bundles_post_ra>
// kernel: tpu_custom_call.1
= control target key start
LH: loop header
LB: loop body
LE: loop exit
PB: predicated region body
PF: predicated region fallthrough
CT: control target
= control target key end

     0   :  { %8 = vsyncpa [#allocation3], 0  ;;  %s348_s0 = inlined_call_operand.hbm [shape: f32[8,32], index: 0, kind: input, shape index: {}]   ;;  %s349_s1 = inlined_call_operand.hbm [shape: f32[32,128], index: 1, kind: input, shape index: {}]   ;;  %s350_s2 = inlined_call_operand.vmem [shape: f32[2,128], index: 2, kind: input, shape index: {}]   ;;  %s351_s3 = inlined_call_operand.hbm [shape: f32[8,128], index: 3, kind: output, shape index: {}]  }
   0x1   :  { %9 = vsyncpa [#allocation6], 0 }
   0x2   :  { %10 = vsyncpa [#allocation4], 0  ;;  %s274_s12 = smov [#allocation2]   ;;  %s275_s14 = smov [#allocation5]  }
   0x3   :  { %s17_s13 = sshll.u32 %s274_s12, 4  ;;  %s26_s15 = sshll.u32 %s275_s14, 4  ;;  %s18_s13 = int_to_ptr.vmem [resolvable:$true] %s17_s13  ;;  %s302_s15 = int_to_ptr.vmem [resolvable:$true] %s26_s15 }
   0x4   :  { %s202_s18 = scalar_lea.hbm %s348_s0, 128 }
   0x5   :  { %p203_p0 = scmp.ne.s32.totalorder %s348_s0, %s202_s18  ;;  %p206_p1 = scmp.lt.u32.totalorder %s202_s18, %s348_s0 }
   0x7   :  { %p208_p2 = pnand %p206_p1, %p203_p0 }
   0x9   :  { %211 = shalt.err (!%p208_p2)
}
   0xa   :  { %s212_s23 = scalar_lea.vmem %s18_s13, 128  ;;  %p217_p4 = scmp.lt.s32.totalorder %s18_s13, %s18_s13 }
   0xb   :  { %p213_p3 = scmp.ne.s32.totalorder %s18_s13, %s212_s23  ;;  %p218_p5 = scmp.lt.s32.totalorder %s212_s23, %s212_s23 }
   0xd   :  { %p219_p6 = por %p218_p5, %p217_p4 }
   0xf   :  { %p220_p7 = pnand %p219_p6, %p213_p3 }
  0x11   :  { %223 = shalt.err (!%p220_p7)
}
  0x12   :  { %20 = dma.hbm_to_vmem [thread:$0]  %s348_s0, 128, %s18_s13, [#allocation3]  }
  0x13   :  { %s224_s28 = scalar_lea.hbm %s349_s1, 512 }
  0x14   :  { %p225_p8 = scmp.ne.s32.totalorder %s349_s1, %s224_s28  ;;  %p228_p9 = scmp.lt.u32.totalorder %s224_s28, %s349_s1 }
  0x16   :  { %p230_p10 = pnand %p228_p9, %p225_p8 }
  0x18   :  { %233 = shalt.err (!%p230_p10)
}
  0x19   :  { %s234_s6 = scalar_lea.vmem %s302_s15, 512  ;;  %p239_p12 = scmp.lt.s32.totalorder %s302_s15, %s302_s15 }
  0x1a   :  { %p235_p11 = scmp.ne.s32.totalorder %s302_s15, %s234_s6  ;;  %p240_p13 = scmp.lt.s32.totalorder %s234_s6, %s234_s6 }
  0x1c   :  { %p241_p0 = por %p240_p13, %p239_p12 }
  0x1e   :  { %p242_p1 = pnand %p241_p0, %p235_p11 }
  0x20   :  { %245 = shalt.err (!%p242_p1)
}
  0x21   :  { %s276_s0 = smov 128   ;;  %s277_s7 = smov 8  }
  0x22   :  { %32 = dma.hbm_to_vmem [thread:$0]  %s349_s1, 512, %s302_s15, [#allocation6], %s276_s0, %s276_s0, %s277_s7  }
  0x23   :  { %268 = dma.done.wait [#allocation3], 128  }
  0x24   :  { %269 = vsyncadd [#allocation3], 4294967168 }
  0x25   :  { %270 = dma.done.wait [#allocation6], 512  }
  0x26   :  { %271 = vsyncadd [#allocation6], 4294966784  ;;  %v278_v0 = vmov 0.0|0.0   ;;  %vm279_vm0 = vmmov 0   ;;  %v280_v1 = vmov 0.0   ;;  %v42_v2 = vld [vmem:[#allocation5] sm:$0xff]  ;;  %v141_v28 = vlaneseq }
  0x27   :  { %186 = vmatprep.subr.bf16.mxu0 %v278_v0  ;;  %183 = vmatprep.mubr.msk.f32.mxu0 %vm279_vm0, %v280_v1  ;;  %v43_v3 = vld [vmem:[#allocation5 + $0x8] sm:$0xff]  ;;  %v44_v4 = vld [vmem:[#allocation5 + $0x10] sm:$0xff]  ;;  %v45_v6 = vld [vmem:[#allocation5 + $0x18] sm:$0xff]  ;;  %vm46_vm1 = vcmask 261120   ;;  %s281_s11 = smov [#allocation7]  }
  0x28   :  { %v187_v5 = vpack.c.bf16 %v43_v3, %v42_v2  ;;  %v190_v7 = vpack.c.bf16 %v45_v6, %v44_v4  ;;  %v41_v8 = vld [vmem:[#allocation2] sm:$0xff]  ;;  %v142_v29 = vshrl.u32 %v141_v28, 7  ;;  %s159_s12 = sshll.u32 %s281_s11, 4  ;;  %s160_s12 = int_to_ptr.vmem [resolvable:$true] %s159_s12 }
  0x29   :  { %v137_v30 = vld [vmem:[%s350_s2] sm:$0x3]  ;;  %s246_s13 = scalar_lea.vmem %s160_s12, 128  ;;  %p251_p3 = scmp.lt.s32.totalorder %s160_s12, %s160_s12 }
  0x2a   :  { %188 = vmatpush3.bf16.msra.mxu0 %v187_v5  ;;  %v143_v31 = vsub.s32 0, %v142_v29  ;;  %v148_v32 = vsub.s32 1, %v142_v29  ;;  %p247_p2 = scmp.ne.s32.totalorder %s160_s12, %s246_s13  ;;  %p252_p4 = scmp.lt.s32.totalorder %s246_s13, %s246_s13 }
  0x2b   :  { %189 = vmatprep.subr.bf16.mxu0 %v278_v0 }
  0x2c   :  { %v149_v36 = vrot.slane %v137_v30, %v148_v32  ;;  %p253_p5 = por %p252_p4, %p251_p3 }
  0x2e   :  { %191 = vmatpush3.bf16.msra.mxu0 %v190_v7  ;;  %p254_p6 = pnand %p253_p5, %p247_p2 }
  0x31   :  { %184 = vmatmul.mubr.msk.f32.vlgmr.msra.gmra.mrb[0].mxu0 %vm46_vm1, %v41_v8 }
 0x104   :  { %v116_v9 = vpop.f32.mrb[0].mxu0 }
 0x105   :  { %v120_v10 = vrot.slane %v116_v9, 4  ;;  %v185_v11 = vpop.f32.mrb[1].mxu0 }
 0x107   :  { %v121_v12 = vadd.f32 %v120_v10, %v116_v9 }
 0x109   :  { %v122_v13 = vrot.slane %v121_v12, 2 }
 0x10b   :  { %v123_v14 = vadd.f32 %v122_v13, %v121_v12 }
 0x10d   :  { %v124_v15 = vrot.slane %v123_v14, 1 }
 0x10f   :  { %v125_v16 = vadd.f32 %v124_v15, %v123_v14 }
 0x111   :  { %v127_v17 = vmul.f32 0.125, %v125_v16 }
 0x113   :  { %v128_v18 = vsub.f32 %v116_v9, %v127_v17 }
 0x115   :  { %v129_v19 = vmul.f32 %v128_v18, %v128_v18 }
 0x117   :  { %v130_v20 = vrot.slane %v129_v19, 4 }
 0x119   :  { %v131_v21 = vadd.f32 %v130_v20, %v129_v19 }
 0x11b   :  { %v132_v22 = vrot.slane %v131_v21, 2 }
 0x11d   :  { %v133_v23 = vadd.f32 %v132_v22, %v131_v21 }
 0x11f   :  { %v134_v24 = vrot.slane %v133_v23, 1 }
 0x121   :  { %v135_v25 = vadd.f32 %v134_v24, %v133_v23 }
 0x123   :  { %v136_v26 = vmul.f32 0.125, %v135_v25 }
 0x125   :  { %v138_v27 = vadd.f32 1e-05, %v136_v26 }
 0x127   :  { %200 = vrsqrt.f32 %v138_v27 }
 0x131   :  { %v201_v33 = vpop.eup %200 }
 0x132   :  { %v140_v34 = vmul.f32 %v201_v33, %v137_v30 }
 0x134   :  { %v144_v35 = vrot.slane %v140_v34, %v143_v31 }
 0x136   :  { %v145_v37 = vmul.f32 %v144_v35, %v128_v18 }
 0x138   :  { %v150_v38 = vadd.f32 %v149_v36, %v145_v37 }
 0x13a   :  { %v151_v39 = vmax.f32 %v150_v38, 0.0 }
 0x13c   :  { %152 = vst [vmem:[#allocation7] sm:$0xff] %v151_v39 }
 0x13d   :  { %257 = shalt.err (!%p254_p6)
}
 0x13e   :  { %s258_s15 = scalar_lea.hbm %s351_s3, 128 }
 0x13f   :  { %p259_p7 = scmp.ne.s32.totalorder %s351_s3, %s258_s15  ;;  %p262_p8 = scmp.lt.u32.totalorder %s258_s15, %s351_s3 }
 0x141   :  { %p264_p9 = pnand %p262_p8, %p259_p7 }
 0x143   :  { %267 = shalt.err (!%p264_p9)
}
 0x144   :  { %162 = dma.vmem_to_hbm [thread:$0]  %s160_s12, 128, %s351_s3, [#allocation4]  }
 0x145   :  { %272 = dma.done.wait [#allocation4], 128  }
 0x146   :  { %273 = vsyncadd [#allocation4], 4294967168 }
 0x147   :  { %166 = vsyncpa [#allocation3], 1 }
 0x148   :  { %167 = vsyncpa [#allocation6], 1 }
 0x149   :  { %168 = vsyncpa [#allocation4], 1 }

</bundles_post_ra>
